<compile_context>
chip_gen: v5e
topology: v5e:2x2
jax: 0.10.0
libtpu: 0.0.40
codegen_flags: <defaults>
</compile_context>

<pallas_src>
import functools

import jax
import jax.numpy as jnp
from jax.experimental import pallas as pl
from jax.experimental.pallas import tpu as pltpu


def _round_up(x, m):
    return (x + m - 1) // m * m


# Whole-pipeline VMEM budget.  12 MiB fits v5e's 16 MiB default scoped limit
# (v6e/v7x default to 32 MiB), so one code path is safe on every generation
# without raising vmem_limit_bytes.
_VMEM_BUDGET_BYTES = 12 * 1024 * 1024
# Above this raw size the resident embedding table is single-buffered.
_TABLE_SINGLE_BUFFER_BYTES = 2 * 1024 * 1024
# Cap on the row tile: at vpad=128 this is a 2 MiB logits block.
_ROW_TILE_CAP = 4096
_NEG_BIG = jnp.float32(-1e30)


def _table_vmem_bytes(vpad):
    raw = vpad * vpad * 4
    # Small tables stay on the default double-buffered path.
    return raw if raw >= _TABLE_SINGLE_BUFFER_BYTES else 2 * raw


def _table_spec(vpad):
    index_map = lambda i: (0, 0)
    if vpad * vpad * 4 >= _TABLE_SINGLE_BUFFER_BYTES:
        # Constant index_map: double-buffering the resident table buys nothing,
        # so single-buffer it to halve its VMEM footprint (matters on v7x).
        return pl.BlockSpec((vpad, vpad), index_map, pipeline_mode=pl.Buffered(1))
    return pl.BlockSpec((vpad, vpad), index_map)


def _pick_tile_m(n_rows, vpad):
    """Largest row tile whose double-buffered pipeline fits the VMEM budget."""
    # Per-row VMEM bytes: double-buffered (TM, vpad) f32 logits block plus the
    # double-buffered (TM, 2) int32 id block (lane-padded to 128 in VMEM).
    per_row = 2 * vpad * 4 + 2 * 128 * 4
    avail = max(_VMEM_BUDGET_BYTES - _table_vmem_bytes(vpad), per_row * 8)
    tile = max(8, min(_ROW_TILE_CAP, avail // per_row) // 8 * 8)
    n_rows8 = _round_up(n_rows, 8)
    # Tiny inputs: one un-pipelined block (nothing to pipeline or megacore-shard).
    return n_rows8 if n_rows8 <= tile else tile


def _pad_table(table, vpad):
    """(V, V) -> (vpad, vpad) f32 with padded columns pre-biased to -1e30.

    Pre-biasing means the kernel needs no per-tile column mask before the
    log-softmax: valid rows gather -1e30 into the padded logits columns,
    which vanish under exp().  Padded rows are never gathered by valid ids.
    """
    V = table.shape[0]
    if vpad == V:
        return table.astype(jnp.float32)
    out = jnp.full((vpad, vpad), _NEG_BIG, dtype=jnp.float32)
    return out.at[:V, :V].set(table.astype(jnp.float32))


def _bigram_train_kernel(idx_tgt_ref, table_ref, logits_ref, loss_ref):
    """One row tile: embedding gather (one-hot @ table) + partial NLL sum."""
    it = idx_tgt_ref[...]                          # (TM, 2) int32
    idx = it[:, 0:1]                               # (TM, 1)
    tgt = it[:, 1:2]                               # (TM, 1)
    table = table_ref[...]                         # (Vpad, Vpad) f32

    tm = it.shape[0]
    vpad = table.shape[1]
    # Shared by the gather one-hot and the target select.
    cols = jax.lax.broadcasted_iota(jnp.int32, (tm, vpad), 1)

    # Embedding lookup as one-hot @ table (128-aligned MXU contraction).
    one_hot = (cols == idx).astype(jnp.float32)
    logits = jnp.dot(one_hot, table, preferred_element_type=jnp.float32)
    logits_ref[...] = logits                       # lane-dense (Vpad) store

    # Numerically stable log-softmax.  Padded vocab columns already hold -1e30
    # (pre-biased table), so no extra mask/select is needed here.
    row_max = jnp.max(logits, axis=-1, keepdims=True)
    shifted = logits - row_max
    lse = jnp.log(jnp.sum(jnp.exp(shifted), axis=-1, keepdims=True))     # (TM, 1)

    # NLL of the target column without a second (TM, Vpad) one-hot.
    picked = jnp.sum(jnp.where(cols == tgt, shifted, 0.0),
                     axis=-1, keepdims=True)                             # (TM, 1)
    nll = lse - picked

    # Padding rows carry tgt == -1 -> excluded from the partial sum.
    # TODO(synk): out-of-range ids/targets (>= vocab) are silently mishandled
    # (zero logits row / huge loss term), matching the unchecked toy model.
    loss_ref[0, 0] = jnp.sum(jnp.where(tgt >= 0, nll, 0.0))


def _bigram_infer_kernel(idx_ref, table_ref, logits_ref):
    """Inference path: embedding gather only, no softmax / loss."""
    idx = idx_ref[...]                             # (TM, 1) int32
    table = table_ref[...]                         # (Vpad, Vpad) f32
    tm = idx.shape[0]
    vpad = table.shape[1]
    cols = jax.lax.broadcasted_iota(jnp.int32, (tm, vpad), 1)
    one_hot = (cols == idx).astype(jnp.float32)
    logits_ref[...] = jnp.dot(one_hot, table, preferred_element_type=jnp.float32)
    # TODO(synk): for multi-thousand vocabs on v7x (64 MiB VMEM) this should
    # become a scalar-prefetch row gather (pl.Element index_map on the table)
    # instead of keeping the whole (Vpad, Vpad) table resident.


@jax.jit
def _train_forward(idx, targets, table):
    B, T = idx.shape
    V = table.shape[0]
    n_rows = B * T

    vpad = _round_up(V, 128)
    tile_m = _pick_tile_m(n_rows, vpad)
    n_rows_pad = _round_up(n_rows, tile_m)
    num_tiles = n_rows_pad // tile_m

    table_pad = _pad_table(table, vpad)

    idx_flat = idx.reshape(-1).astype(jnp.int32)
    tgt_flat = targets.reshape(-1).astype(jnp.int32)
    idx_tgt = jnp.stack([idx_flat, tgt_flat], axis=-1)            # (n_rows, 2)
    if n_rows_pad != n_rows:
        # Padding rows: idx = -1 (all-zero one-hot), tgt = -1 (dropped from loss).
        idx_tgt = jnp.pad(idx_tgt, ((0, n_rows_pad - n_rows), (0, 0)),
                          constant_values=-1)

    logits_pad, loss_parts = pl.pallas_call(
        _bigram_train_kernel,
        out_shape=(
            jax.ShapeDtypeStruct((n_rows_pad, vpad), jnp.float32),
            jax.ShapeDtypeStruct((num_tiles, 1), jnp.float32),
        ),
        grid_spec=pltpu.PrefetchScalarGridSpec(
            num_scalar_prefetch=0,
            grid=(num_tiles,),
            in_specs=[
                pl.BlockSpec((tile_m, 2), lambda i: (i, 0)),      # packed idx/tgt
                _table_spec(vpad),                                # resident table
            ],
            out_specs=[
                pl.BlockSpec((tile_m, vpad), lambda i: (i, 0)),   # lane-dense logits
                pl.BlockSpec((1, 1), lambda i: (i, 0),
                             memory_space=pltpu.MemorySpace.SMEM),  # per-tile NLL sum
            ],
        ),
        compiler_params=pltpu.CompilerParams(
            dimension_semantics=(("parallel",) if num_tiles > 1
                                 else ("arbitrary",))),
    )(idx_tgt, table_pad)

    # Un-padding happens inside this jit, so it fuses with the pallas output
    # instead of a separate eager dispatch re-copying the logits.  When V is a
    # multiple of 128 and n_rows a multiple of the tile, there is no slice at all.
    logits = logits_pad
    if vpad != V or n_rows_pad != n_rows:
        logits = logits_pad[:n_rows, :V]
    loss = jnp.sum(loss_parts) / jnp.float32(n_rows)
    return logits, loss


@jax.jit
def _infer_forward(idx, table):
    B, T = idx.shape
    V = table.shape[0]
    n_rows = B * T

    vpad = _round_up(V, 128)
    tile_m = _pick_tile_m(n_rows, vpad)
    n_rows_pad = _round_up(n_rows, tile_m)
    num_tiles = n_rows_pad // tile_m

    table_pad = _pad_table(table, vpad)

    idx_col = idx.reshape(-1, 1).astype(jnp.int32)
    if n_rows_pad != n_rows:
        idx_col = jnp.pad(idx_col, ((0, n_rows_pad - n_rows), (0, 0)))

    logits_pad = pl.pallas_call(
        _bigram_infer_kernel,
        out_shape=jax.ShapeDtypeStruct((n_rows_pad, vpad), jnp.float32),
        grid_spec=pltpu.PrefetchScalarGridSpec(
            num_scalar_prefetch=0,
            grid=(num_tiles,),
            in_specs=[
                pl.BlockSpec((tile_m, 1), lambda i: (i, 0)),
                _table_spec(vpad),
            ],
            out_specs=pl.BlockSpec((tile_m, vpad), lambda i: (i, 0)),
        ),
        compiler_params=pltpu.CompilerParams(
            dimension_semantics=(("parallel",) if num_tiles > 1
                                 else ("arbitrary",))),
    )(idx_col, table_pad)

    logits = logits_pad
    if vpad != V or n_rows_pad != n_rows:
        logits = logits_pad[:n_rows, :V]
    return logits.reshape(B, T, V)


def bigram_forward(idx, table, targets=None):
    """Mirrors BigramLanguageModel.forward.

    idx:     (B, T) int token ids
    table:   (V, V) float32 embedding table (nn.Embedding weight)
    targets: optional (B, T) int token ids

    Returns (logits, loss):
      - targets is None -> logits (B, T, V), loss None
      - targets given   -> logits (B*T, V),  loss scalar float32
    """
    if targets is None:
        return _infer_forward(idx, table), None
    return _train_forward(idx, targets, table)


if __name__ == "__main__":
    key = jax.random.PRNGKey(0)
    k_table, k_idx, k_tgt = jax.random.split(key, 3)

    vocab_size = 65   # e.g. tiny-shakespeare char vocab
    B, T = 2, 8

    # nn.Embedding default init is N(0, 1).
    table = jax.random.normal(k_table, (vocab_size, vocab_size), dtype=jnp.float32)
    idx = jax.random.randint(k_idx, (B, T), 0, vocab_size, dtype=jnp.int32)
    targets = jax.random.randint(k_tgt, (B, T), 0, vocab_size, dtype=jnp.int32)

    # Training-style call (targets supplied).
    logits, loss = bigram_forward(idx, table, targets)
    jax.block_until_ready((logits, loss))

    # Inference-style call (no targets, no softmax work).
    logits_inf, loss_none = bigram_forward(idx, table, None)
    jax.block_until_ready(logits_inf)

    # Reference check in plain JAX.
    ref_logits = table[idx.reshape(-1)]                       # (B*T, V)
    ref_logp = jax.nn.log_softmax(ref_logits, axis=-1)
    ref_loss = -jnp.mean(ref_logp[jnp.arange(B * T), targets.reshape(-1)])

    assert logits.shape == (B * T, vocab_size)
    assert logits_inf.shape == (B, T, vocab_size)
    assert loss_none is None
    assert jnp.allclose(logits, ref_logits, atol=1e-5)
    assert jnp.allclose(logits_inf.reshape(B * T, vocab_size), ref_logits, atol=1e-5)
    assert jnp.allclose(loss, ref_loss, atol=1e-5)

    print("KERNEL_OK")
</pallas_src>

<mosaic_0001>
module attributes {stable_mosaic.version = 11 : i64} {
  func.func @_bigram_train_kernel(%arg0: i32, %arg1: memref<16x2xi32, #tpu.memory_space<vmem>>, %arg2: memref<128x128xf32, #tpu.memory_space<vmem>>, %arg3: memref<16x128xf32, #tpu.memory_space<vmem>>, %arg4: memref<1x1xf32, #tpu.memory_space<smem>>) attributes {dimension_semantics = [#tpu.dimension_semantics<arbitrary>], iteration_bounds = array<i64: 1>, scalar_prefetch = 0 : i64, scratch_operands = 0 : i64, tpu.core_type = #tpu.core_type<tc>, window_params = [{transform_indices = @transform_0, window_bounds = array<i64: 16, 2>}, {pipeline_mode = #tpu.pipeline_mode<synchronous>, transform_indices = @transform_1, window_bounds = array<i64: 128, 128>}, {transform_indices = @transform_2, window_bounds = array<i64: 16, 128>}, {transform_indices = @transform_3, window_bounds = array<i64: 1, 1>}]} {
    %c0 = arith.constant 0 : index
    %c0_0 = arith.constant 0 : index
    %0 = vector.load %arg1[%c0, %c0_0] : memref<16x2xi32, #tpu.memory_space<vmem>>, vector<16x2xi32>
    %1 = vector.extract_strided_slice %0 {offsets = [0, 0], sizes = [16, 1], strides = [1, 1]} : vector<16x2xi32> to vector<16x1xi32>
    %2 = vector.extract_strided_slice %0 {offsets = [0, 1], sizes = [16, 1], strides = [1, 1]} : vector<16x2xi32> to vector<16x1xi32>
    %c0_1 = arith.constant 0 : index
    %c0_2 = arith.constant 0 : index
    %3 = vector.load %arg2[%c0_1, %c0_2] : memref<128x128xf32, #tpu.memory_space<vmem>>, vector<128x128xf32>
    %4 = tpu.iota {dimensions = array<i32: 1>} : vector<16x128xi32>
    %5 = vector.broadcast %1 : vector<16x1xi32> to vector<16x128xi32>
    %6 = arith.cmpi eq, %4, %5 : vector<16x128xi32>
    %7 = arith.extui %6 : vector<16x128xi1> to vector<16x128xi32>
    %8 = arith.sitofp %7 : vector<16x128xi32> to vector<16x128xf32>
    %cst = arith.constant dense<0.000000e+00> : vector<16x128xf32>
    %9 = tpu.matmul %8, %3, %cst {dimension_numbers = #tpu.dot_dimension_numbers<[1], [0], [0], [1], [0, 0, 1, 1], [], []>} : vector<16x128xf32>, vector<128x128xf32>, vector<16x128xf32> -> vector<16x128xf32>
    %c0_3 = arith.constant 0 : index
    %c0_4 = arith.constant 0 : index
    %10 = vector.load %arg3[%c0_3, %c0_4] : memref<16x128xf32, #tpu.memory_space<vmem>>, vector<16x128xf32>
    tpu.vector_store %arg3[%c0_3, %c0_4], %9 {strides = array<i32>} : memref<16x128xf32, #tpu.memory_space<vmem>>, vector<16x128xf32>,
    %cst_5 = arith.constant dense<0xFF800000> : vector<16xf32>
    %11 = vector.multi_reduction <maximumf>, %9, %cst_5 [1] : vector<16x128xf32> to vector<16xf32>
    %12 = vector.shape_cast %11 : vector<16xf32> to vector<16x1xf32>
    %13 = vector.broadcast %12 : vector<16x1xf32> to vector<16x128xf32>
    %14 = arith.subf %9, %13 : vector<16x128xf32>
    %15 = math.exp %14 : vector<16x128xf32>
    %cst_6 = arith.constant dense<0.000000e+00> : vector<16xf32>
    %16 = vector.multi_reduction <add>, %15, %cst_6 [1] : vector<16x128xf32> to vector<16xf32>
    %17 = vector.shape_cast %16 : vector<16xf32> to vector<16x1xf32>
    %18 = math.log %17 : vector<16x1xf32>
    %19 = vector.broadcast %2 : vector<16x1xi32> to vector<16x128xi32>
    %20 = arith.cmpi eq, %4, %19 : vector<16x128xi32>
    %cst_7 = arith.constant 0.000000e+00 : f32
    %21 = vector.broadcast %cst_7 : f32 to vector<16x128xf32>
    %22 = arith.select %20, %14, %21 : vector<16x128xi1>, vector<16x128xf32>
    %cst_8 = arith.constant dense<0.000000e+00> : vector<16xf32>
    %23 = vector.multi_reduction <add>, %22, %cst_8 [1] : vector<16x128xf32> to vector<16xf32>
    %24 = vector.shape_cast %23 : vector<16xf32> to vector<16x1xf32>
    %25 = arith.subf %18, %24 : vector<16x1xf32>
    %c0_i32 = arith.constant 0 : i32
    %26 = vector.broadcast %c0_i32 : i32 to vector<16x1xi32>
    %27 = arith.cmpi sge, %2, %26 : vector<16x1xi32>
    %cst_9 = arith.constant 0.000000e+00 : f32
    %28 = vector.broadcast %cst_9 : f32 to vector<16x1xf32>
    %29 = arith.select %27, %25, %28 : vector<16x1xi1>, vector<16x1xf32>
    %30 = vector.shape_cast %29 : vector<16x1xf32> to vector<1x16x1xf32>
    %cst_10 = arith.constant dense<0.000000e+00> : vector<1xf32>
    %31 = vector.multi_reduction <add>, %30, %cst_10 [1, 2] : vector<1x16x1xf32> to vector<1xf32>
    %32 = vector.shape_cast %31 : vector<1xf32> to vector<1x1x1xf32>
    %33 = vector.extract %32[0, 0, 0] : f32 from vector<1x1x1xf32>
    %c0_11 = arith.constant 0 : index
    %c0_12 = arith.constant 0 : index
    %34 = memref.load %arg4[%c0_11, %c0_12] : memref<1x1xf32, #tpu.memory_space<smem>>
    memref.store %33, %arg4[%c0_11, %c0_12] : memref<1x1xf32, #tpu.memory_space<smem>>
    return
  }
  func.func @transform_0(%arg0: i32) -> (i32, i32) {
    %c0_i32 = arith.constant 0 : i32
    %c0_i32_0 = arith.constant 0 : i32
    return %arg0, %c0_i32 : i32, i32
  }
  func.func @transform_1(%arg0: i32) -> (i32, i32) {
    %c0_i32 = arith.constant 0 : i32
    %c0_i32_0 = arith.constant 0 : i32
    %c0_i32_1 = arith.constant 0 : i32
    return %c0_i32, %c0_i32_0 : i32, i32
  }
  func.func @transform_2(%arg0: i32) -> (i32, i32) {
    %c0_i32 = arith.constant 0 : i32
    %c0_i32_0 = arith.constant 0 : i32
    return %arg0, %c0_i32 : i32, i32
  }
  func.func @transform_3(%arg0: i32) -> (i32, i32) {
    %c0_i32 = arith.constant 0 : i32
    %c0_i32_0 = arith.constant 0 : i32
    return %arg0, %c0_i32 : i32, i32
  }
}

</mosaic_0001>

<bundles_post_ra>
// kernel: _train_forward.1
= control target key start
LH: loop header
LB: loop body
LE: loop exit
PB: predicated region body
PF: predicated region fallthrough
CT: control target
= control target key end

     0   :  { %9 = vsyncpa [#allocation3], 0  ;;  %v247_v2 = vmov 0   ;;  %s345_s0 = inlined_call_operand.vmem [shape: s32[16,2], index: 0, kind: input, shape index: {}]   ;;  %s346_s1 = inlined_call_operand.vmem [shape: f32[128,128], index: 1, kind: input, shape index: {}]   ;;  %s347_s2 = inlined_call_operand.hbm [shape: f32[16,128], index: 2, kind: output, shape index: {0}]   ;;  %s348_s3 = inlined_call_operand.hbm [shape: f32[1,1], index: 3, kind: output, shape index: {1}]  }
   0x1   :  { %v278_v0 = vld [vmem:[%s345_s0] sm:$0xff]  ;;  %v32_v1 = vld [vmem:[%s346_s1 + $0x78] sm:$0xff]  ;;  %196 = vset.pattern.permute.xlu0 %v247_v2  ;;  %v31_v3 = vld [vmem:[%s346_s1 + $0x70] sm:$0xff] }
   0x2   :  { %47 = vmatpush.msra.mxu0 %v32_v1  ;;  %36 = vperm.xlu0 %196, %v278_v0   ;;  %v30_v4 = vld [vmem:[%s346_s1 + $0x68] sm:$0xff]  ;;  %v29_v5 = vld [vmem:[%s346_s1 + $0x60] sm:$0xff] }
   0x3   :  { %170 = vmatpush.msra.mxu1 %v32_v1 }
   0x4   :  { %48 = vmatpush.msra.mxu0 %v31_v3 }
   0x5   :  { %171 = vmatpush.msra.mxu1 %v31_v3 }
   0x6   :  { %49 = vmatpush.msra.mxu0 %v30_v4 }
   0x7   :  { %10 = vsyncpa [#allocation4], 0  ;;  %v28_v6 = vld [vmem:[%s346_s1 + $0x58] sm:$0xff]  ;;  %172 = vmatpush.msra.mxu1 %v30_v4  ;;  %v299_v7 = vld [vmem:[%s345_s0 + $0x8] sm:$0xff]  ;;  %v33_v19 = vlaneseq  ;;  %v248_v22 = vmov 1.0   ;;  %v249_v24 = vmov 1  }
   0x8   :  { %50 = vmatpush.msra.mxu0 %v29_v5  ;;  %v27_v8 = vld [vmem:[%s346_s1 + $0x50] sm:$0xff]  ;;  %v26_v9 = vld [vmem:[%s346_s1 + $0x48] sm:$0xff]  ;;  %v25_v10 = vld [vmem:[%s346_s1 + $0x40] sm:$0xff]  ;;  %197 = vset.pattern.permute.xlu2 %v249_v24  ;;  %vm106_vm4 = vcmp.ge.s32.totalorder %v278_v0, 0  ;;  %vm107_vm5 = vcmp.ge.s32.totalorder %v299_v7, 0  ;;  %vm118_vm6 = vcmask 7168  }
   0x9   :  { %173 = vmatpush.msra.mxu1 %v29_v5  ;;  %v24_v11 = vld [vmem:[%s346_s1 + $0x38] sm:$0xff]  ;;  %v23_v12 = vld [vmem:[%s346_s1 + $0x30] sm:$0xff]  ;;  %v22_v13 = vld [vmem:[%s346_s1 + $0x28] sm:$0xff]  ;;  %v34_v20 = vand.u32 127, %v33_v19  ;;  %91 = vperm.xlu2 %197, %v278_v0   ;;  %s251_s20 = smov [#allocation2]   ;;  %s139_s24 = sshll.u32 %s347_s2, 4  ;;  %s140_s24 = int_to_ptr.hbm [resolvable:$true] %s139_s24 }
   0xa   :  { %51 = vmatpush.msra.mxu0 %v28_v6  ;;  %39 = vperm.xlu0 %196, %v299_v7   ;;  %v21_v14 = vld [vmem:[%s346_s1 + $0x20] sm:$0xff]  ;;  %v20_v15 = vld [vmem:[%s346_s1 + $0x18] sm:$0xff]  ;;  %v19_v16 = vld [vmem:[%s346_s1 + $0x10] sm:$0xff]  ;;  %s137_s21 = sshll.u32 %s251_s20, 4  ;;  %s252_s25 = smov 128   ;;  %s138_s21 = int_to_ptr.vmem [resolvable:$true] %s137_s21 }
   0xb   :  { %174 = vmatpush.msra.mxu1 %v28_v6  ;;  %v18_v17 = vld [vmem:[%s346_s1 + $0x8] sm:$0xff]  ;;  %v17_v18 = vld [vmem:[%s346_s1] sm:$0xff]  ;;  %s250_s1 = smov 127   ;;  %s253_s26 = smov 8  }
   0xc   :  { %52 = vmatpush.msra.mxu0 %v27_v8  ;;  %s151_s29 = sshll.u32 %s348_s3, 4  ;;  %s254_s2 = smov [#allocation5]   ;;  %s152_s29 = int_to_ptr.hbm [resolvable:$true] %s151_s29 }
   0xd   :  { %175 = vmatpush.msra.mxu1 %v27_v8 }
   0xe   :  { %53 = vmatpush.msra.mxu0 %v26_v9 }
   0xf   :  { %176 = vmatpush.msra.mxu1 %v26_v9 }
  0x10   :  { %54 = vmatpush.msra.mxu0 %v25_v10 }
  0x11   :  { %177 = vmatpush.msra.mxu1 %v25_v10  ;;  %94 = vperm.xlu2 %197, %v299_v7  }
  0x12   :  { %55 = vmatpush.msra.mxu0 %v24_v11  ;;  %198 = vset.pattern.permute.xlu0 %v249_v24 }
  0x13   :  { %178 = vmatpush.msra.mxu1 %v24_v11 }
  0x14   :  { %56 = vmatpush.msra.mxu0 %v23_v12 }
  0x15   :  { %179 = vmatpush.msra.mxu1 %v23_v12 }
  0x16   :  { %57 = vmatpush.msra.mxu0 %v22_v13 }
  0x17   :  { %180 = vmatpush.msra.mxu1 %v22_v13 }
  0x18   :  { %58 = vmatpush.msra.mxu0 %v21_v14 }
  0x19   :  { %181 = vmatpush.msra.mxu1 %v21_v14 }
  0x1a   :  { %59 = vmatpush.msra.mxu0 %v20_v15 }
  0x1b   :  { %182 = vmatpush.msra.mxu1 %v20_v15 }
  0x1c   :  { %60 = vmatpush.msra.mxu0 %v19_v16 }
  0x1d   :  { %183 = vmatpush.msra.mxu1 %v19_v16 }
  0x1e   :  { %61 = vmatpush.msra.mxu0 %v18_v17 }
  0x1f   :  { %184 = vmatpush.msra.mxu1 %v18_v17 }
  0x20   :  { %62 = vmatpush.msra.mxu0 %v17_v18 }
  0x21   :  { %185 = vmatpush.msra.mxu1 %v17_v18 }
  0x63   :  { %v92_v27 = vpop.permute.xlu2 %91 }
  0x64   :  { %vm96_vm2 = vcmp.eq.s32.totalorder %v34_v20, %v92_v27 }
  0x6b   :  { %v95_v37 = vpop.permute.xlu2 %94 }
  0x6c   :  { %vm97_vm3 = vcmp.eq.s32.totalorder %v34_v20, %v95_v37 }
  0x74   :  { %v37_v21 = vpop.permute.xlu0 %36 }
  0x75   :  { %vm41_vm0 = vcmp.eq.s32.totalorder %v34_v20, %v37_v21 }
  0x76   :  { %168 = vmatmul.msk.f32.vlgmr.msra.gmra.mxu0 %vm41_vm0, %v248_v22 }
  0x7c   :  { %v40_v23 = vpop.permute.xlu0 %39 }
  0x7d   :  { %vm42_vm1 = vcmp.eq.s32.totalorder %v34_v20, %v40_v23 }
  0x7e   :  { %169 = vmatmul.msk.f32.vlgmr.msra.gmra.mxu1 %vm42_vm1, %v248_v22 }
  0xf3   :  { %v64_v25 = vpop.f32.mrf.mxu0 }
  0xf4   :  { %70 = vst [vmem:[#allocation2] sm:$0xff] %v64_v25  ;;  %72 = vmax.xlane.f32.xlu1 %v64_v25 }
  0xfb   :  { %v67_v26 = vpop.f32.mrf.mxu1 }
  0xfc   :  { %71 = vst [vmem:[#allocation2 + $0x8] sm:$0xff] %v67_v26  ;;  %74 = vmax.xlane.f32.xlu1 %v67_v26 }
  0xfd   :  { %145 = dma.vmem_to_hbm [thread:$0]  %s138_s21, 256, %s140_s24, [#allocation3], %s252_s25, %s252_s25, %s253_s26  }
 0x167   :  { %v73_v28 = vpop.xlane.xlu1 %72 }
 0x168   :  { %v76_v29 = vsub.f32 %v64_v25, %v73_v28 }
 0x16a   :  { %v78_v30 = vmul.f32 1.442695, %v76_v29  ;;  %v98_v31 = vsel %vm96_vm2, %v76_v29, 0.0 }
 0x16b   :  { %100 = vadd.xlane.f32.xlu2 %v98_v31 }
 0x16c   :  { %199 = vpow2.f32 %v78_v30 }
 0x16f   :  { %v75_v32 = vpop.xlane.xlu1 %74 }
 0x170   :  { %v77_v33 = vsub.f32 %v67_v26, %v75_v32 }
 0x172   :  { %v200_v34 = vpop.eup %199  ;;  %v80_v35 = vmul.f32 1.442695, %v77_v33  ;;  %v99_v38 = vsel %vm97_vm3, %v77_v33, 0.0 }
 0x173   :  { %82 = vadd.xlane.f32.xlu0 %v200_v34 }
 0x174   :  { %201 = vpow2.f32 %v80_v35 }
 0x17a   :  { %v202_v36 = vpop.eup %201 }
 0x17b   :  { %84 = vadd.xlane.f32.xlu1 %v202_v36 }
 0x183   :  { %102 = vadd.xlane.f32.xlu1 %v99_v38 }
 0x1de   :  { %v101_v43 = vpop.xlane.xlu2 %100 }
 0x1e6   :  { %v83_v39 = vpop.xlane.xlu0 %82 }
 0x1e7   :  { %203 = vlog2.f32 %v83_v39 }
 0x1ed   :  { %v204_v40 = vpop.eup %203 }
 0x1ee   :  { %v87_v41 = vmul.f32 0.6931472, %v204_v40  ;;  %v85_v42 = vpop.xlane.xlu1 %84 }
 0x1ef   :  { %205 = vlog2.f32 %v85_v42 }
 0x1f0   :  { %v104_v44 = vsub.f32 %v87_v41, %v101_v43 }
 0x1f2   :  { %v108_v45 = vsel %vm106_vm4, %v104_v44, 0.0 }
 0x1f3   :  { %112 = vrot.lane.b32.xlu1 %v108_v45, %s250_s1 }
 0x1f5   :  { %v206_v46 = vpop.eup %205 }
 0x1f6   :  { %v89_v47 = vmul.f32 0.6931472, %v206_v46  ;;  %v103_v48 = vpop.xlane.xlu1 %102 }
 0x1f8   :  { %v105_v49 = vsub.f32 %v89_v47, %v103_v48 }
 0x1fa   :  { %v109_v50 = vsel %vm107_vm5, %v105_v49, 0.0 }
 0x1fb   :  { %114 = vrot.lane.b32.xlu1 %v109_v50, %s250_s1 }
 0x265   :  { %v113_v51 = vpop.permute.xlu1 %112 }
 0x266   :  { %v119_v53 = vsel %vm118_vm6, %v113_v51, 0.0 }
 0x26d   :  { %v115_v52 = vpop.permute.xlu1 %114 }
 0x26e   :  { %v120_v54 = vsel %vm118_vm6, %v115_v52, 0.0 }
 0x26f   :  { %v121_v55 = vadd.f32 %v120_v54, %v119_v53 }
 0x271   :  { %122 = vadd.xlane.f32.xlu2 %v121_v55 }
 0x2e4   :  { %v123_v56 = vpop.xlane.xlu2 %122 }
 0x2e5   :  { %v124_v57 = vrot.slane %v123_v56, 4 }
 0x2e7   :  { %v125_v58 = vadd.f32 %v124_v57, %v123_v56 }
 0x2e9   :  { %v126_v59 = vrot.slane %v125_v58, 2 }
 0x2eb   :  { %v127_v60 = vadd.f32 %v126_v59, %v125_v58 }
 0x2ed   :  { %v128_v61 = vrot.slane %v127_v60, 1 }
 0x2ef   :  { %v129_v62 = vadd.f32 %v128_v61, %v127_v60 }
 0x2f1   :  { %186 = vpush %v129_v62 }
 0x322   :  { %s187_s30 = spop %186 }
 0x323   :  { %132 = sst [smem:[#allocation5]] %s187_s30 }
 0x324   :  { %154 = dma.smem_to_hbm %s254_s2, 16, %s152_s29, [#allocation4]  }
 0x325   :  { %243 = dma.done.wait [#allocation3], 256  }
 0x326   :  { %244 = vsyncadd [#allocation3], 4294967040 }
 0x327   :  { %245 = dma.done.wait [#allocation4], 16  }
 0x328   :  { %246 = vsyncadd [#allocation4], 4294967280 }
 0x329   :  { %163 = sfence }
 0x32a   :  { %164 = vsyncpa [#allocation3], 1 }
 0x32b   :  { %165 = vsyncpa [#allocation4], 1 }

</bundles_post_ra>
